<compile_context>
chip_gen: v5e
topology: v5e:2x2
jax: 0.10.0
libtpu: 0.0.40
codegen_flags: <defaults>
</compile_context>

<pallas_src>
import functools

import jax
import jax.numpy as jnp
from jax import lax
from jax.experimental import pallas as pl
from jax.experimental.pallas import tpu as pltpu

_LANE = 128


def _round_up(x, m):
    return ((x + m - 1) // m) * m


def _cdiv(a, b):
    return -(-a // b)


def _sublane_multiple(dtype):
    # Minimum packed sublane tile per itemsize (f32 -> 8, bf16 -> 16, int8/fp8 -> 32).
    return {4: 8, 2: 16, 1: 32}.get(jnp.dtype(dtype).itemsize, 8)


def _vmem_cap_bytes():
    """Generation-aware VMEM cap, leaving headroom for compiler scratch."""
    try:
        cap = int(pltpu.get_tpu_info().vmem_capacity_bytes)
    except Exception:
        cap = 64 << 20  # conservative (v7x-sized) fallback
    return max(16 << 20, (cap * 4) // 5)  # ~51 MiB on v7x, ~102 MiB on v5e/v6e


def _bf16_act_ok():
    """bf16 EUP/VPU exist on v6e/v7x; v5e has no bf16 tanh path."""
    try:
        kind = jax.devices()[0].device_kind.lower()
    except Exception:
        return True
    return "v5" not in kind


def _resident_spec(block_shape):
    """Spec for an operand whose index_map is constant across the grid.

    Single-buffer it so the weight stack is not duplicated in VMEM; fall back
    to the default (double-buffered) spec on jax versions without
    pipeline_mode.  Returns (spec, single_buffered)."""
    index_map = lambda i: (0,) * len(block_shape)
    buffered = getattr(pl, "Buffered", None)
    if buffered is not None:
        try:
            return pl.BlockSpec(block_shape, index_map,
                                pipeline_mode=buffered(1)), True
        except TypeError:
            pass
    return pl.BlockSpec(block_shape, index_map), False


def _fnn_kernel(x_ref, w_in_ref, b_in_ref, *rest, num_hidden_layers, act_dtype):
    """Fused MLP: input layer -> tanh -> hidden layers -> tanh -> output."""
    if num_hidden_layers > 0:
        w_hid_ref, b_hid_ref, w_out_ref, b_out_ref, o_ref = rest
    else:
        w_out_ref, b_out_ref, o_ref = rest

    compute_dtype = w_in_ref.dtype  # f32 or bf16; MXU accumulation is always f32.

    def layer(h, w, b):
        acc = jnp.dot(h, w, preferred_element_type=jnp.float32)
        acc = acc + b.astype(jnp.float32)
        # tanh in bf16 on v6e/v7x (EUP bf16 path), f32 otherwise.
        return jnp.tanh(acc.astype(act_dtype))

    # Input layer + activation.
    h = layer(x_ref[...], w_in_ref[...], b_in_ref[...])

    # Hidden layers: bounded-code-size loop with dynamic layer indexing into
    # the stacked [L, H_p, H_p] weight block; partial unroll keeps LLO
    # visibility without blowing up live temporaries for large L.
    if num_hidden_layers > 0:
        def body(i, h):
            return layer(h.astype(compute_dtype), w_hid_ref[i], b_hid_ref[i])

        h = lax.fori_loop(0, num_hidden_layers, body, h,
                          unroll=min(num_hidden_layers, 4))

    # Output layer (no activation). d_out is kept at its logical width (no
    # 128-padding) to avoid a 64x inflated writeback for tiny output dims.
    o_ref[...] = (
        jnp.dot(h.astype(compute_dtype), w_out_ref[...],
                preferred_element_type=jnp.float32)
        + b_out_ref[...].astype(jnp.float32)
    ).astype(o_ref.dtype)


def prepare_fnn_params(params, *, compute_dtype=jnp.float32, act_dtype=None):
    """One-time padding/casting of the weight stack (hoisted out of the per-call path).

    params: dict with w_in [D_in,H], b_in [1,H], w_hid [L,H,H], b_hid [L,1,H],
            w_out [H,D_out], b_out [1,D_out]  (weights stored [in, out]).
    Returns (prepared_arrays, meta)."""
    cdt = jnp.dtype(compute_dtype)
    w_in, b_in = params["w_in"], params["b_in"]
    w_hid, b_hid = params["w_hid"], params["b_hid"]
    w_out, b_out = params["w_out"], params["b_out"]
    d_in, H = w_in.shape
    L = w_hid.shape[0]
    d_out = w_out.shape[1]

    # Only the hidden dim is padded to a lane multiple (zero padding is inert:
    # padded rows/cols and biases are 0, so padded lanes stay 0 through tanh's
    # matmul inputs and never reach the logical output columns).
    # TODO(synk): on v6e/v7x a 256-multiple H pad can improve MXU utilization
    # once the kernel is MXU-bound (large H); verify with a bundle dump first.
    H_p = _round_up(H, _LANE)

    def pad2(a, rows, cols):
        return jnp.pad(a, ((0, rows - a.shape[0]), (0, cols - a.shape[1])))

    prepared = {
        "w_in": pad2(w_in, d_in, H_p).astype(cdt),
        "b_in": pad2(b_in, 1, H_p).astype(cdt),
        "w_out": pad2(w_out, H_p, d_out).astype(cdt),
        "b_out": b_out.astype(cdt),
    }
    if L > 0:
        prepared["w_hid"] = jnp.pad(
            w_hid, ((0, 0), (0, H_p - H), (0, H_p - H))).astype(cdt)
        prepared["b_hid"] = jnp.pad(
            b_hid, ((0, 0), (0, 0), (0, H_p - H))).astype(cdt)

    if act_dtype is None:
        act_dtype = (jnp.bfloat16
                     if (cdt == jnp.bfloat16 and _bf16_act_ok())
                     else jnp.float32)

    meta = dict(d_in=d_in, d_out=d_out, H=H, H_p=H_p, L=L,
                compute_dtype=cdt, act_dtype=jnp.dtype(act_dtype))
    return prepared, meta


def fnn_forward(x, prepared, meta, *, tile_b=None):
    """Run the fused FNN kernel on x [B, d_in] with prepared params."""
    B, d_in = x.shape
    assert d_in == meta["d_in"], "x feature dim does not match params"
    cdt = meta["compute_dtype"]
    d_out, H_p, L = meta["d_out"], meta["H_p"], meta["L"]
    out_dtype = x.dtype

    # Batch tile: dtype-aware sublane multiple; default targets >= 4 grid
    # steps (>= 2 per TensorCore on v7x) while staying large enough to
    # amortize the ~0.35us per-step overhead.
    mult = _sublane_multiple(cdt)
    if tile_b is None:
        tile_b = min(1024, max(mult, _round_up(_cdiv(B, 4), mult)))
    tile_b = _round_up(tile_b, mult)
    B_p = _round_up(B, tile_b)
    grid = (B_p // tile_b,)

    # Per-call work on x only (weights were prepared once, outside).
    x_p = x
    if B_p != B:
        x_p = jnp.pad(x_p, ((0, B_p - B), (0, 0)))
    if x_p.dtype != cdt:
        x_p = x_p.astype(cdt)

    args = [x_p, prepared["w_in"], prepared["b_in"]]
    # x/out are streamed (tiled on batch, double-buffered); d_in stays at its
    # logical width -- BlockSpec last dims may equal the full array dims.
    in_specs = [pl.BlockSpec((tile_b, d_in), lambda i: (i, 0))]
    single_buffered = True
    for arr in (prepared["w_in"], prepared["b_in"]):
        spec, ok = _resident_spec(arr.shape)
        in_specs.append(spec)
        single_buffered &= ok
    if L > 0:
        args += [prepared["w_hid"], prepared["b_hid"]]
        for arr in (prepared["w_hid"], prepared["b_hid"]):
            spec, ok = _resident_spec(arr.shape)
            in_specs.append(spec)
            single_buffered &= ok
    args += [prepared["w_out"], prepared["b_out"]]
    for arr in (prepared["w_out"], prepared["b_out"]):
        spec, ok = _resident_spec(arr.shape)
        in_specs.append(spec)
        single_buffered &= ok

    # VMEM budget: weights once (single-buffered), streamed x/out twice
    # (double-buffered), a few live f32 [tile_b, H_p] activations, headroom.
    weight_bytes = sum(int(a.size) * a.dtype.itemsize for a in args[1:])
    weight_bytes *= 1 if single_buffered else 2
    io_bytes = 2 * (tile_b * d_in * cdt.itemsize
                    + tile_b * d_out * jnp.dtype(out_dtype).itemsize)
    act_bytes = 4 * tile_b * H_p * 4
    vmem_bytes = int(min(weight_bytes + io_bytes + act_bytes + (8 << 20),
                         _vmem_cap_bytes()))

    flops = 2 * B_p * (d_in * H_p + L * H_p * H_p + H_p * d_out)
    transcendentals = B_p * H_p * (L + 1)
    bytes_accessed = int(x_p.size * cdt.itemsize
                         + sum(int(a.size) * a.dtype.itemsize for a in args[1:])
                         + B_p * d_out * jnp.dtype(out_dtype).itemsize)

    kernel = functools.partial(_fnn_kernel, num_hidden_layers=L,
                               act_dtype=meta["act_dtype"])

    out_p = pl.pallas_call(
        kernel,
        out_shape=jax.ShapeDtypeStruct((B_p, d_out), out_dtype),
        grid_spec=pltpu.PrefetchScalarGridSpec(
            num_scalar_prefetch=0,
            grid=grid,
            in_specs=in_specs,
            out_specs=pl.BlockSpec((tile_b, d_out), lambda i: (i, 0)),
        ),
        compiler_params=pltpu.CompilerParams(
            dimension_semantics=("parallel",),
            vmem_limit_bytes=vmem_bytes,
        ),
        cost_estimate=pl.CostEstimate(
            flops=flops,
            transcendentals=transcendentals,
            bytes_accessed=bytes_accessed,
        ),
    )(*args)

    # Slice away the batch padding (d_out was never padded).
    return out_p[:B, :]


def init_fnn_params(key, input_dim, output_dim, num_hidden, hidden_dim):
    """Init mimicking PyTorch nn.Linear default U(-1/sqrt(fan_in), +).

    Weights stored as [in_features, out_features] (transposed vs. PyTorch)."""
    L = num_hidden - 1
    keys = jax.random.split(key, 2 * (L + 2))

    def lin(kw, kb, fan_in, fan_out):
        bound = 1.0 / jnp.sqrt(fan_in)
        w = jax.random.uniform(kw, (fan_in, fan_out), jnp.float32, -bound, bound)
        b = jax.random.uniform(kb, (1, fan_out), jnp.float32, -bound, bound)
        return w, b

    w_in, b_in = lin(keys[0], keys[1], input_dim, hidden_dim)
    w_hid_list, b_hid_list = [], []
    for i in range(L):
        w, b = lin(keys[2 + 2 * i], keys[3 + 2 * i], hidden_dim, hidden_dim)
        w_hid_list.append(w)
        b_hid_list.append(b)
    if L > 0:
        w_hid = jnp.stack(w_hid_list, axis=0)                     # [L, H, H]
        b_hid = jnp.stack(b_hid_list, axis=0)                     # [L, 1, H]
    else:
        w_hid = jnp.zeros((0, hidden_dim, hidden_dim), jnp.float32)
        b_hid = jnp.zeros((0, 1, hidden_dim), jnp.float32)
    w_out, b_out = lin(keys[-2], keys[-1], hidden_dim, output_dim)
    return dict(w_in=w_in, b_in=b_in, w_hid=w_hid, b_hid=b_hid,
                w_out=w_out, b_out=b_out)


def fnn_reference(x, params):
    h = jnp.tanh(x @ params["w_in"] + params["b_in"])
    for i in range(params["w_hid"].shape[0]):
        h = jnp.tanh(h @ params["w_hid"][i] + params["b_hid"][i])
    return h @ params["w_out"] + params["b_out"]


if __name__ == "__main__":
    # Small, module-consistent shapes; batch large enough to exercise tiling.
    batch = 512
    input_dim = 4
    output_dim = 2
    num_hidden = 3          # -> 2 hidden (H,H) layers after the input layer
    hidden_dim = 32

    key = jax.random.PRNGKey(0)
    kx, kp = jax.random.split(key)
    x = jax.random.normal(kx, (batch, input_dim), jnp.float32)
    params = init_fnn_params(kp, input_dim, output_dim, num_hidden, hidden_dim)

    ref = fnn_reference(x, params)

    # f32 path: tile_b=128 -> 4 parallel grid steps (>= 2 per TC on v7x).
    prep_f32, meta_f32 = prepare_fnn_params(params, compute_dtype=jnp.float32)
    out = jax.block_until_ready(fnn_forward(x, prep_f32, meta_f32, tile_b=128))
    assert out.shape == (batch, output_dim)
    assert jnp.allclose(out, ref, atol=1e-5, rtol=1e-5), "f32 mismatch vs reference"

    # bf16 weights/activations, f32 MXU accumulation (bf16 tanh on v6e/v7x).
    prep_bf16, meta_bf16 = prepare_fnn_params(params, compute_dtype=jnp.bfloat16)
    out_bf16 = jax.block_until_ready(
        fnn_forward(x, prep_bf16, meta_bf16, tile_b=128))
    assert out_bf16.shape == (batch, output_dim)
    assert jnp.allclose(out_bf16, ref, atol=1e-1, rtol=1e-1), "bf16 mismatch vs reference"

    print("KERNEL_OK")
</pallas_src>

<mosaic_0001>
module attributes {stable_mosaic.version = 11 : i64} {
  func.func @_fnn_kernel(%arg0: i32, %arg1: memref<128x4xf32, #tpu.memory_space<vmem>>, %arg2: memref<4x128xf32, #tpu.memory_space<vmem>>, %arg3: memref<1x128xf32, #tpu.memory_space<vmem>>, %arg4: memref<2x128x128xf32, #tpu.memory_space<vmem>>, %arg5: memref<2x1x128xf32, #tpu.memory_space<vmem>>, %arg6: memref<128x2xf32, #tpu.memory_space<vmem>>, %arg7: memref<1x2xf32, #tpu.memory_space<vmem>>, %arg8: memref<128x2xf32, #tpu.memory_space<vmem>>) attributes {dimension_semantics = [#tpu.dimension_semantics<parallel>], iteration_bounds = array<i64: 4>, scalar_prefetch = 0 : i64, scratch_operands = 0 : i64, tpu.core_type = #tpu.core_type<tc>, window_params = [{transform_indices = @transform_0, window_bounds = array<i64: 128, 4>}, {pipeline_mode = #tpu.pipeline_mode<synchronous>, transform_indices = @transform_1, window_bounds = array<i64: 4, 128>}, {pipeline_mode = #tpu.pipeline_mode<synchronous>, transform_indices = @transform_2, window_bounds = array<i64: 1, 128>}, {pipeline_mode = #tpu.pipeline_mode<synchronous>, transform_indices = @transform_3, window_bounds = array<i64: 2, 128, 128>}, {pipeline_mode = #tpu.pipeline_mode<synchronous>, transform_indices = @transform_4, window_bounds = array<i64: 2, 1, 128>}, {pipeline_mode = #tpu.pipeline_mode<synchronous>, transform_indices = @transform_5, window_bounds = array<i64: 128, 2>}, {pipeline_mode = #tpu.pipeline_mode<synchronous>, transform_indices = @transform_6, window_bounds = array<i64: 1, 2>}, {transform_indices = @transform_7, window_bounds = array<i64: 128, 2>}]} {
    %c0 = arith.constant 0 : index
    %c0_0 = arith.constant 0 : index
    %0 = vector.load %arg1[%c0, %c0_0] : memref<128x4xf32, #tpu.memory_space<vmem>>, vector<128x4xf32>
    %c0_1 = arith.constant 0 : index
    %c0_2 = arith.constant 0 : index
    %1 = vector.load %arg2[%c0_1, %c0_2] : memref<4x128xf32, #tpu.memory_space<vmem>>, vector<4x128xf32>
    %c0_3 = arith.constant 0 : index
    %c0_4 = arith.constant 0 : index
    %2 = vector.load %arg3[%c0_3, %c0_4] : memref<1x128xf32, #tpu.memory_space<vmem>>, vector<1x128xf32>
    %cst = arith.constant dense<0.000000e+00> : vector<128x128xf32>
    %3 = tpu.matmul %0, %1, %cst {dimension_numbers = #tpu.dot_dimension_numbers<[1], [0], [0], [1], [0, 0, 1, 1], [], []>} : vector<128x4xf32>, vector<4x128xf32>, vector<128x128xf32> -> vector<128x128xf32>
    %4 = vector.broadcast %2 : vector<1x128xf32> to vector<128x128xf32>
    %5 = arith.addf %3, %4 : vector<128x128xf32>
    %6 = math.tanh %5 : vector<128x128xf32>
    %c0_i32 = arith.constant 0 : i32
    %7 = arith.index_cast %c0_i32 : i32 to index
    %c0_5 = arith.constant 0 : index
    %c0_6 = arith.constant 0 : index
    %8 = vector.load %arg4[%7, %c0_5, %c0_6] : memref<2x128x128xf32, #tpu.memory_space<vmem>>, vector<1x128x128xf32>
    %9 = vector.shape_cast %8 : vector<1x128x128xf32> to vector<128x128xf32>
    %10 = arith.index_cast %c0_i32 : i32 to index
    %c0_7 = arith.constant 0 : index
    %c0_8 = arith.constant 0 : index
    %11 = vector.load %arg5[%10, %c0_7, %c0_8] : memref<2x1x128xf32, #tpu.memory_space<vmem>>, vector<1x1x128xf32>
    %12 = vector.shape_cast %11 : vector<1x1x128xf32> to vector<1x128xf32>
    %cst_9 = arith.constant dense<0.000000e+00> : vector<128x128xf32>
    %13 = tpu.matmul %6, %9, %cst_9 {dimension_numbers = #tpu.dot_dimension_numbers<[1], [0], [0], [1], [0, 0, 1, 1], [], []>} : vector<128x128xf32>, vector<128x128xf32>, vector<128x128xf32> -> vector<128x128xf32>
    %14 = vector.broadcast %12 : vector<1x128xf32> to vector<128x128xf32>
    %15 = arith.addf %13, %14 : vector<128x128xf32>
    %16 = math.tanh %15 : vector<128x128xf32>
    %c1_i32 = arith.constant 1 : i32
    %17 = arith.index_cast %c1_i32 : i32 to index
    %c0_10 = arith.constant 0 : index
    %c0_11 = arith.constant 0 : index
    %18 = vector.load %arg4[%17, %c0_10, %c0_11] : memref<2x128x128xf32, #tpu.memory_space<vmem>>, vector<1x128x128xf32>
    %19 = vector.shape_cast %18 : vector<1x128x128xf32> to vector<128x128xf32>
    %20 = arith.index_cast %c1_i32 : i32 to index
    %c0_12 = arith.constant 0 : index
    %c0_13 = arith.constant 0 : index
    %21 = vector.load %arg5[%20, %c0_12, %c0_13] : memref<2x1x128xf32, #tpu.memory_space<vmem>>, vector<1x1x128xf32>
    %22 = vector.shape_cast %21 : vector<1x1x128xf32> to vector<1x128xf32>
    %cst_14 = arith.constant dense<0.000000e+00> : vector<128x128xf32>
    %23 = tpu.matmul %16, %19, %cst_14 {dimension_numbers = #tpu.dot_dimension_numbers<[1], [0], [0], [1], [0, 0, 1, 1], [], []>} : vector<128x128xf32>, vector<128x128xf32>, vector<128x128xf32> -> vector<128x128xf32>
    %24 = vector.broadcast %22 : vector<1x128xf32> to vector<128x128xf32>
    %25 = arith.addf %23, %24 : vector<128x128xf32>
    %26 = math.tanh %25 : vector<128x128xf32>
    %c2_i32 = arith.constant 2 : i32
    %c0_15 = arith.constant 0 : index
    %c0_16 = arith.constant 0 : index
    %27 = vector.load %arg6[%c0_15, %c0_16] : memref<128x2xf32, #tpu.memory_space<vmem>>, vector<128x2xf32>
    %cst_17 = arith.constant dense<0.000000e+00> : vector<128x2xf32>
    %28 = tpu.matmul %26, %27, %cst_17 {dimension_numbers = #tpu.dot_dimension_numbers<[1], [0], [0], [1], [0, 0, 1, 1], [], []>} : vector<128x128xf32>, vector<128x2xf32>, vector<128x2xf32> -> vector<128x2xf32>
    %c0_18 = arith.constant 0 : index
    %c0_19 = arith.constant 0 : index
    %29 = vector.load %arg7[%c0_18, %c0_19] : memref<1x2xf32, #tpu.memory_space<vmem>>, vector<1x2xf32>
    %30 = vector.broadcast %29 : vector<1x2xf32> to vector<128x2xf32>
    %31 = arith.addf %28, %30 : vector<128x2xf32>
    %c0_20 = arith.constant 0 : index
    %c0_21 = arith.constant 0 : index
    %32 = vector.load %arg8[%c0_20, %c0_21] : memref<128x2xf32, #tpu.memory_space<vmem>>, vector<128x2xf32>
    tpu.vector_store %arg8[%c0_20, %c0_21], %31 {strides = array<i32>} : memref<128x2xf32, #tpu.memory_space<vmem>>, vector<128x2xf32>,
    return
  }
  func.func @transform_0(%arg0: i32) -> (i32, i32) {
    %c0_i32 = arith.constant 0 : i32
    %c0_i32_0 = arith.constant 0 : i32
    return %arg0, %c0_i32 : i32, i32
  }
  func.func @transform_1(%arg0: i32) -> (i32, i32) {
    %c0_i32 = arith.constant 0 : i32
    %c0_i32_0 = arith.constant 0 : i32
    %c0_i32_1 = arith.constant 0 : i32
    return %c0_i32, %c0_i32_0 : i32, i32
  }
  func.func @transform_2(%arg0: i32) -> (i32, i32) {
    %c0_i32 = arith.constant 0 : i32
    %c0_i32_0 = arith.constant 0 : i32
    %c0_i32_1 = arith.constant 0 : i32
    return %c0_i32, %c0_i32_0 : i32, i32
  }
  func.func @transform_3(%arg0: i32) -> (i32, i32, i32) {
    %c0_i32 = arith.constant 0 : i32
    %c0_i32_0 = arith.constant 0 : i32
    %c0_i32_1 = arith.constant 0 : i32
    %c0_i32_2 = arith.constant 0 : i32
    return %c0_i32, %c0_i32_0, %c0_i32_1 : i32, i32, i32
  }
  func.func @transform_4(%arg0: i32) -> (i32, i32, i32) {
    %c0_i32 = arith.constant 0 : i32
    %c0_i32_0 = arith.constant 0 : i32
    %c0_i32_1 = arith.constant 0 : i32
    %c0_i32_2 = arith.constant 0 : i32
    return %c0_i32, %c0_i32_0, %c0_i32_1 : i32, i32, i32
  }
  func.func @transform_5(%arg0: i32) -> (i32, i32) {
    %c0_i32 = arith.constant 0 : i32
    %c0_i32_0 = arith.constant 0 : i32
    %c0_i32_1 = arith.constant 0 : i32
    return %c0_i32, %c0_i32_0 : i32, i32
  }
  func.func @transform_6(%arg0: i32) -> (i32, i32) {
    %c0_i32 = arith.constant 0 : i32
    %c0_i32_0 = arith.constant 0 : i32
    %c0_i32_1 = arith.constant 0 : i32
    return %c0_i32, %c0_i32_0 : i32, i32
  }
  func.func @transform_7(%arg0: i32) -> (i32, i32) {
    %c0_i32 = arith.constant 0 : i32
    %c0_i32_0 = arith.constant 0 : i32
    return %arg0, %c0_i32 : i32, i32
  }
}

</mosaic_0001>

<bundles_post_ra>
// kernel: tpu_custom_call.1
= control target key start
LH: loop header
LB: loop body
LE: loop exit
PB: predicated region body
PF: predicated region fallthrough
CT: control target
= control target key end

     0   :  { %s1016_s24 = smov 0   ;;  %s1321_s0 = inlined_call_operand.vmem [shape: f32[512,4], index: 0, kind: input, shape index: {}]   ;;  %s1322_s1 = inlined_call_operand.vmem [shape: f32[4,128], index: 1, kind: input, shape index: {}]   ;;  %s1323_s2 = inlined_call_operand.vmem [shape: f32[1,128], index: 2, kind: input, shape index: {}]   ;;  %s1324_s3 = inlined_call_operand.vmem [shape: f32[2,128,128], index: 3, kind: input, shape index: {}]   ;;  %s1325_s4 = inlined_call_operand.vmem [shape: f32[2,1,128], index: 4, kind: input, shape index: {}]   ;;  %s1326_s5 = inlined_call_operand.vmem [shape: f32[128,2], index: 5, kind: input, shape index: {}]   ;;  %s1327_s6 = inlined_call_operand.vmem [shape: f32[1,2], index: 6, kind: input, shape index: {}]   ;;  %s1328_s7 = inlined_call_operand.vmem [shape: f32[512,2], index: 7, kind: output, shape index: {}]  }
   0x1 LB: > { %s799_s25 = sadd.s32 4294967295, %s974_s24   ;;  %p803_p0 = scmp.ge.s32.totalorder %s974_s24, 1  ;;  %s974_s24 = sphi %s1016_s24, %s17_s24  }
   0x2   : > { %p238_p1 = scmp.lt.s32.totalorder %s974_s24, 5 }
   0x4   : > { %p239_p2 = pnand %p803_p0, %p238_p1 }
   0x5   : > { %s804_s28 = sshll.u32 (!%p239_p2), %s799_s25, 4 }
   0x6   : > { %242 = sbr.rel (%p239_p2) target bundleno = 681 (0x2a9), region = 48  ;;  %p271_p3 = scmp.lt.s32.totalorder (!%p239_p2), %s804_s28, 63 }
   0xb   : > { %v298_v0 = vld [vmem:[%s1322_s1] sm:$0xf]  ;;  %vm352_vm0 = vcmask 1043456   ;;  %v452_v1 = vld [vmem:[%s1324_s3 + $0x78] sm:$0xff]  ;;  %v451_v2 = vld [vmem:[%s1324_s3 + $0x70] sm:$0xff]  ;;  %s1330_s28 = smov (!%p271_p3, %s804_s28), 63 }
   0xc   : > { %808 = vmatpush.msk.msra.mxu0 %vm352_vm0, %v298_v0  ;;  %844 = vmatpush.msra.mxu1 %v452_v1  ;;  %v450_v3 = vld [vmem:[%s1324_s3 + $0x68] sm:$0xff]  ;;  %s805_s12 = sshll.u32 %s1330_s28, 3  ;;  %vm303_vm1 = vcmask 31744   ;;  %v449_v4 = vld [vmem:[%s1324_s3 + $0x60] sm:$0xff]  ;;  %v448_v6 = vld [vmem:[%s1324_s3 + $0x58] sm:$0xff]  ;;  %vm726_vm2 = vcmask 15360  }
   0xd   : > { %s1044_s15 = scalar_lea.vmem %s1321_s0, %s805_s12  ;;  %v447_v8 = vld [vmem:[%s1324_s3 + $0x50] sm:$0xff]  ;;  %v446_v10 = vld [vmem:[%s1324_s3 + $0x48] sm:$0xff]  ;;  %v445_v12 = vld [vmem:[%s1324_s3 + $0x40] sm:$0xff]  ;;  %s1284_s17 = scalar_lea.vmem %s1328_s7, %s805_s12 }
   0xe   : > { %457 = vmatpush.msrb.mxu0 %v452_v1  ;;  %845 = vmatpush.msra.mxu1 %v451_v2  ;;  %v282_v5 = vld [vmem:[%s1044_s15] sm:$0xff]  ;;  %v283_v7 = vld [vmem:[%s1044_s15 + $0x8] sm:$0xff]  ;;  %v284_v9 = vld [vmem:[%s1044_s15 + $0x10] sm:$0xff] }
   0xf   : > { %809 = vmatmul.msk.f32.vlgmr.msra.gmra.mxu0 %vm303_vm1, %v282_v5  ;;  %v285_v11 = vld [vmem:[%s1044_s15 + $0x18] sm:$0xff]  ;;  %v286_v13 = vld [vmem:[%s1044_s15 + $0x20] sm:$0xff]  ;;  %v287_v15 = vld [vmem:[%s1044_s15 + $0x28] sm:$0xff] }
  0x10   : > { %458 = vmatpush.msrb.mxu0 %v451_v2  ;;  %846 = vmatpush.msra.mxu1 %v450_v3  ;;  %v444_v14 = vld [vmem:[%s1324_s3 + $0x38] sm:$0xff]  ;;  %v443_v16 = vld [vmem:[%s1324_s3 + $0x30] sm:$0xff]  ;;  %v442_v18 = vld [vmem:[%s1324_s3 + $0x28] sm:$0xff] }
  0x11   : > { %v288_v17 = vld [vmem:[%s1044_s15 + $0x30] sm:$0xff]  ;;  %v289_v19 = vld [vmem:[%s1044_s15 + $0x38] sm:$0xff]  ;;  %v441_v20 = vld [vmem:[%s1324_s3 + $0x20] sm:$0xff] }
  0x12   : > { %459 = vmatpush.msrb.mxu0 %v450_v3  ;;  %847 = vmatpush.msra.mxu1 %v449_v4  ;;  %v290_v21 = vld [vmem:[%s1044_s15 + $0x40] sm:$0xff]  ;;  %v440_v22 = vld [vmem:[%s1324_s3 + $0x18] sm:$0xff]  ;;  %v291_v23 = vld [vmem:[%s1044_s15 + $0x48] sm:$0xff] }
  0x13   : > { %v439_v24 = vld [vmem:[%s1324_s3 + $0x10] sm:$0xff]  ;;  %v438_v26 = vld [vmem:[%s1324_s3 + $0x8] sm:$0xff]  ;;  %v293_v27 = vld [vmem:[%s1044_s15 + $0x58] sm:$0xff] }
  0x14   : > { %460 = vmatpush.msrb.mxu0 %v449_v4  ;;  %848 = vmatpush.msra.mxu1 %v448_v6  ;;  %v292_v25 = vld [vmem:[%s1044_s15 + $0x50] sm:$0xff]  ;;  %v294_v28 = vld [vmem:[%s1044_s15 + $0x60] sm:$0xff]  ;;  %v295_v30 = vld [vmem:[%s1044_s15 + $0x68] sm:$0xff] }
  0x15   : > { %v437_v29 = vld [vmem:[%s1324_s3] sm:$0xff]  ;;  %v296_v31 = vld [vmem:[%s1044_s15 + $0x70] sm:$0xff]  ;;  %v297_v32 = vld [vmem:[%s1044_s15 + $0x78] sm:$0xff] }
  0x16   : > { %461 = vmatpush.msrb.mxu0 %v448_v6  ;;  %849 = vmatpush.msra.mxu1 %v447_v8  ;;  %v1120_v33 = vld [vmem:[%s1323_s2] ss:$0 sm:$0xff]  ;;  %v840_v2 = vld [vmem:[%s1324_s3 + $0xf8] sm:$0xff]  ;;  %v839_v3 = vld [vmem:[%s1324_s3 + $0xf0] sm:$0xff] }
  0x17   : > { %810 = vmatmul.msk.f32.gmra.mxu0 %vm303_vm1, %v283_v7  ;;  %560 = vmatpush.msra.mxu2 %v840_v2  ;;  %v838_v4 = vld [vmem:[%s1324_s3 + $0xe8] sm:$0xff]  ;;  %v837_v5 = vld [vmem:[%s1324_s3 + $0xe0] sm:$0xff] }
  0x18   : > { %462 = vmatpush.msrb.mxu0 %v447_v8  ;;  %850 = vmatpush.msra.mxu1 %v446_v10 }
  0x19   : > { %561 = vmatpush.msra.mxu2 %v839_v3  ;;  %v656_v3 = vld [vmem:[%s1326_s5 + $0x78] sm:$0xff] }
  0x1a   : > { %463 = vmatpush.msrb.mxu0 %v446_v10  ;;  %851 = vmatpush.msra.mxu1 %v445_v12  ;;  %v835_v10 = vld [vmem:[%s1324_s3 + $0xd0] sm:$0xff] }
  0x1b   : > { %562 = vmatpush.msra.mxu2 %v838_v4  ;;  %661 = vmatpush.msra.mxu3 %v656_v3 }
  0x1c   : > { %464 = vmatpush.msrb.mxu0 %v445_v12  ;;  %852 = vmatpush.msra.mxu1 %v444_v14  ;;  %v833_v12 = vld [vmem:[%s1324_s3 + $0xc0] sm:$0xff] }
  0x1d   : > { %563 = vmatpush.msra.mxu2 %v837_v5 }
  0x1e   : > { %465 = vmatpush.msrb.mxu0 %v444_v14  ;;  %853 = vmatpush.msra.mxu1 %v443_v16 }
  0x1f   : > { %811 = vmatmul.msk.f32.gmra.mxu0 %vm303_vm1, %v284_v9  ;;  %v836_v9 = vld [vmem:[%s1324_s3 + $0xd8] sm:$0xff] }
  0x20   : > { %466 = vmatpush.msrb.mxu0 %v443_v16  ;;  %854 = vmatpush.msra.mxu1 %v442_v18  ;;  %v832_v16 = vld [vmem:[%s1324_s3 + $0xb8] sm:$0xff] }
  0x21   : > { %564 = vmatpush.msra.mxu2 %v836_v9  ;;  %v653_v9 = vld [vmem:[%s1326_s5 + $0x60] sm:$0xff] }
  0x22   : > { %467 = vmatpush.msrb.mxu0 %v442_v18  ;;  %855 = vmatpush.msra.mxu1 %v441_v20  ;;  %v830_v18 = vld [vmem:[%s1324_s3 + $0xa8] sm:$0xff] }
  0x23   : > { %565 = vmatpush.msra.mxu2 %v835_v10  ;;  %v652_v10 = vld [vmem:[%s1326_s5 + $0x58] sm:$0xff] }
  0x24   : > { %468 = vmatpush.msrb.mxu0 %v441_v20  ;;  %856 = vmatpush.msra.mxu1 %v440_v22 }
  0x26   : > { %469 = vmatpush.msrb.mxu0 %v440_v22  ;;  %857 = vmatpush.msra.mxu1 %v439_v24 }
  0x27   : > { %812 = vmatmul.msk.f32.gmra.mxu0 %vm303_vm1, %v285_v11  ;;  %v834_v11 = vld [vmem:[%s1324_s3 + $0xc8] sm:$0xff] }
  0x28   : > { %470 = vmatpush.msrb.mxu0 %v439_v24  ;;  %858 = vmatpush.msra.mxu1 %v438_v26  ;;  %v827_v24 = vld [vmem:[%s1324_s3 + $0x90] sm:$0xff] }
  0x29   : > { %566 = vmatpush.msra.mxu2 %v834_v11 }
  0x2a   : > { %471 = vmatpush.msrb.mxu0 %v438_v26  ;;  %859 = vmatpush.msra.mxu1 %v437_v29  ;;  %v825_v26 = vld [vmem:[%s1324_s3 + $0x80] sm:$0xff] }
  0x2b   : > { %567 = vmatpush.msra.mxu2 %v833_v12 }
  0x2c   : > { %472 = vmatpush.msrb.mxu0 %v437_v29 }
  0x2d   : > { %568 = vmatpush.msra.mxu2 %v832_v16  ;;  %v649_v16 = vld [vmem:[%s1326_s5 + $0x40] sm:$0xff] }
  0x2f   : > { %813 = vmatmul.msk.f32.gmra.mxu0 %vm303_vm1, %v286_v13 }
  0x37   : > { %814 = vmatmul.msk.f32.gmra.mxu0 %vm303_vm1, %v287_v15 }
  0x3f   : > { %815 = vmatmul.msk.f32.gmra.mxu0 %vm303_vm1, %v288_v17  ;;  %v831_v17 = vld [vmem:[%s1324_s3 + $0xb0] sm:$0xff] }
  0x40   : > { %569 = vmatpush.msra.mxu2 %v831_v17  ;;  %v648_v17 = vld [vmem:[%s1326_s5 + $0x38] sm:$0xff] }
  0x42   : > { %570 = vmatpush.msra.mxu2 %v830_v18  ;;  %v647_v18 = vld [vmem:[%s1326_s5 + $0x30] sm:$0xff] }
  0x47   : > { %816 = vmatmul.msk.f32.gmra.mxu0 %vm303_vm1, %v289_v19  ;;  %v829_v19 = vld [vmem:[%s1324_s3 + $0xa0] sm:$0xff] }
  0x48   : > { %571 = vmatpush.msra.mxu2 %v829_v19 }
  0x4f   : > { %817 = vmatmul.msk.f32.gmra.mxu0 %vm303_vm1, %v290_v21 }
  0x57   : > { %818 = vmatmul.msk.f32.gmra.mxu0 %vm303_vm1, %v291_v23  ;;  %v828_v23 = vld [vmem:[%s1324_s3 + $0x98] sm:$0xff] }
  0x58   : > { %572 = vmatpush.msra.mxu2 %v828_v23  ;;  %v645_v23 = vld [vmem:[%s1326_s5 + $0x20] sm:$0xff] }
  0x5a   : > { %573 = vmatpush.msra.mxu2 %v827_v24  ;;  %v644_v24 = vld [vmem:[%s1326_s5 + $0x18] sm:$0xff] }
  0x5f   : > { %819 = vmatmul.msk.f32.gmra.mxu0 %vm303_vm1, %v292_v25  ;;  %v826_v25 = vld [vmem:[%s1324_s3 + $0x88] sm:$0xff] }
  0x60   : > { %574 = vmatpush.msra.mxu2 %v826_v25 }
  0x62   : > { %575 = vmatpush.msra.mxu2 %v825_v26  ;;  %v643_v26 = vld [vmem:[%s1326_s5 + $0x10] sm:$0xff] }
  0x67   : > { %820 = vmatmul.msk.f32.gmra.mxu0 %vm303_vm1, %v293_v27 }
  0x6f   : > { %821 = vmatmul.msk.f32.gmra.mxu0 %vm303_vm1, %v294_v28 }
  0x77   : > { %822 = vmatmul.msk.f32.gmra.mxu0 %vm303_vm1, %v295_v30 }
  0x7f   : > { %823 = vmatmul.msk.f32.gmra.mxu0 %vm303_vm1, %v296_v31 }
  0x87   : > { %824 = vmatmul.msk.f32.gmra.mxu0 %vm303_vm1, %v297_v32 }
  0x8c   : > { %v373_v34 = vpop.f32.mrf.mxu0 }
  0x8d   : > { %v374_v35 = vadd.f32 %v1120_v33, %v373_v34 }
  0x8f   : > { %872 = vtanh.f32 %v374_v35  ;;  %v1189_v35 = vld [vmem:[%s1325_s4] ss:$0 sm:$0xff] }
  0x94   : > { %v376_v36 = vpop.f32.mrf.mxu0 }
  0x95   : > { %v873_v37 = vpop.eup %872  ;;  %v377_v38 = vadd.f32 %v1120_v33, %v376_v36 }
  0x96   : > { %473 = vmatmul.f32.vlgmr.msrb.gmra.mxu0 %v873_v37 }
  0x97   : > { %874 = vtanh.f32 %v377_v38 }
  0x9c   : > { %v379_v39 = vpop.f32.mrf.mxu0 }
  0x9d   : > { %v875_v40 = vpop.eup %874  ;;  %v380_v41 = vadd.f32 %v1120_v33, %v379_v39 }
  0x9e   : > { %476 = vmatmul.f32.vlgmr.msra.gmra.mxu1 %v875_v40 }
  0x9f   : > { %876 = vtanh.f32 %v380_v41 }
  0xa4   : > { %v382_v42 = vpop.f32.mrf.mxu0 }
  0xa5   : > { %v877_v43 = vpop.eup %876  ;;  %v383_v44 = vadd.f32 %v1120_v33, %v382_v42 }
  0xa6   : > { %479 = vmatmul.f32.gmra.mxu1 %v877_v43 }
  0xa7   : > { %878 = vtanh.f32 %v383_v44 }
  0xac   : > { %v385_v45 = vpop.f32.mrf.mxu0 }
  0xad   : > { %v879_v46 = vpop.eup %878  ;;  %v386_v47 = vadd.f32 %v1120_v33, %v385_v45 }
  0xae   : > { %482 = vmatmul.f32.gmra.mxu1 %v879_v46 }
  0xaf   : > { %880 = vtanh.f32 %v386_v47 }
  0xb4   : > { %v388_v48 = vpop.f32.mrf.mxu0 }
  0xb5   : > { %v881_v49 = vpop.eup %880  ;;  %v389_v50 = vadd.f32 %v1120_v33, %v388_v48 }
  0xb6   : > { %485 = vmatmul.f32.gmra.mxu1 %v881_v49 }
  0xb7   : > { %882 = vtanh.f32 %v389_v50 }
  0xbc   : > { %v391_v51 = vpop.f32.mrf.mxu0 }
  0xbd   : > { %v883_v52 = vpop.eup %882  ;;  %v392_v53 = vadd.f32 %v1120_v33, %v391_v51 }
  0xbe   : > { %488 = vmatmul.f32.gmra.mxu1 %v883_v52 }
  0xbf   : > { %884 = vtanh.f32 %v392_v53 }
  0xc4   : > { %v394_v54 = vpop.f32.mrf.mxu0 }
  0xc5   : > { %v885_v55 = vpop.eup %884  ;;  %v395_v56 = vadd.f32 %v1120_v33, %v394_v54 }
  0xc6   : > { %491 = vmatmul.f32.gmra.mxu1 %v885_v55 }
  0xc7   : > { %886 = vtanh.f32 %v395_v56 }
  0xcc   : > { %v397_v57 = vpop.f32.mrf.mxu0 }
  0xcd   : > { %v887_v58 = vpop.eup %886  ;;  %v398_v59 = vadd.f32 %v1120_v33, %v397_v57 }
  0xce   : > { %494 = vmatmul.f32.gmra.mxu1 %v887_v58 }
  0xcf   : > { %888 = vtanh.f32 %v398_v59 }
  0xd4   : > { %v400_v60 = vpop.f32.mrf.mxu0 }
  0xd5   : > { %v889_v61 = vpop.eup %888  ;;  %v401_v62 = vadd.f32 %v1120_v33, %v400_v60 }
  0xd6   : > { %497 = vmatmul.f32.gmra.mxu1 %v889_v61 }
  0xd7   : > { %890 = vtanh.f32 %v401_v62 }
  0xdc   : > { %v403_v63 = vpop.f32.mrf.mxu0 }
  0xdd   : > { %v891_v0 = vpop.eup %890  ;;  %v404_v1 = vadd.f32 %v1120_v33, %v403_v63 }
  0xde   : > { %500 = vmatmul.f32.gmra.mxu1 %v891_v0 }
  0xdf   : > { %892 = vtanh.f32 %v404_v1 }
  0xe4   : > { %v406_v6 = vpop.f32.mrf.mxu0 }
  0xe5   : > { %v893_v7 = vpop.eup %892  ;;  %v407_v8 = vadd.f32 %v1120_v33, %v406_v6 }
  0xe6   : > { %503 = vmatmul.f32.gmra.mxu1 %v893_v7  ;;  %v655_v7 = vld [vmem:[%s1326_s5 + $0x70] sm:$0xff] }
  0xe7   : > { %894 = vtanh.f32 %v407_v8  ;;  %662 = vmatpush.msra.mxu3 %v655_v7  ;;  %v654_v8 = vld [vmem:[%s1326_s5 + $0x68] sm:$0xff] }
  0xe9   : > { %663 = vmatpush.msra.mxu3 %v654_v8 }
  0xeb   : > { %664 = vmatpush.msra.mxu3 %v653_v9 }
  0xec   : > { %v409_v13 = vpop.f32.mrf.mxu0 }
  0xed   : > { %v895_v14 = vpop.eup %894  ;;  %v410_v15 = vadd.f32 %v1120_v33, %v409_v13  ;;  %665 = vmatpush.msra.mxu3 %v652_v10 }
  0xee   : > { %506 = vmatmul.f32.gmra.mxu1 %v895_v14  ;;  %v651_v14 = vld [vmem:[%s1326_s5 + $0x50] sm:$0xff] }
  0xef   : > { %896 = vtanh.f32 %v410_v15  ;;  %666 = vmatpush.msra.mxu3 %v651_v14  ;;  %v650_v15 = vld [vmem:[%s1326_s5 + $0x48] sm:$0xff] }
  0xf1   : > { %667 = vmatpush.msra.mxu3 %v650_v15 }
  0xf3   : > { %668 = vmatpush.msra.mxu3 %v649_v16 }
  0xf4   : > { %v412_v20 = vpop.f32.mrf.mxu0 }
  0xf5   : > { %v897_v21 = vpop.eup %896  ;;  %v413_v22 = vadd.f32 %v1120_v33, %v412_v20  ;;  %669 = vmatpush.msra.mxu3 %v648_v17 }
  0xf6   : > { %509 = vmatmul.f32.gmra.mxu1 %v897_v21 }
  0xf7   : > { %898 = vtanh.f32 %v413_v22  ;;  %v646_v22 = vld [vmem:[%s1326_s5 + $0x28] sm:$0xff]  ;;  %670 = vmatpush.msra.mxu3 %v647_v18 }
  0xf9   : > { %671 = vmatpush.msra.mxu3 %v646_v22 }
  0xfb   : > { %672 = vmatpush.msra.mxu3 %v645_v23 }
  0xfc   : > { %v415_v27 = vpop.f32.mrf.mxu0 }
  0xfd   : > { %v899_v28 = vpop.eup %898  ;;  %v416_v29 = vadd.f32 %v1120_v33, %v415_v27  ;;  %673 = vmatpush.msra.mxu3 %v644_v24 }
  0xfe   : > { %512 = vmatmul.f32.gmra.mxu1 %v899_v28 }
  0xff   : > { %900 = vtanh.f32 %v416_v29  ;;  %v642_v29 = vld [vmem:[%s1326_s5 + $0x8] sm:$0xff]  ;;  %674 = vmatpush.msra.mxu3 %v643_v26 }
 0x101   : > { %675 = vmatpush.msra.mxu3 %v642_v29 }
 0x104   : > { %v418_v30 = vpop.f32.mrf.mxu0 }
 0x105   : > { %v901_v31 = vpop.eup %900  ;;  %v419_v32 = vadd.f32 %v1120_v33, %v418_v30  ;;  %v641_v30 = vld [vmem:[%s1326_s5] sm:$0xff] }
 0x106   : > { %515 = vmatmul.f32.gmra.mxu1 %v901_v31  ;;  %676 = vmatpush.msra.mxu3 %v641_v30 }
 0x107   : > { %902 = vtanh.f32 %v419_v32 }
 0x10d   : > { %v903_v34 = vpop.eup %902 }
 0x10e   : > { %518 = vmatmul.f32.gmra.mxu1 %v903_v34 }
 0x113   : > { %v474_v36 = vpop.f32.mrf.mxu0 }
 0x114   : > { %v475_v37 = vadd.f32 %v1189_v35, %v474_v36 }
 0x116   : > { %904 = vtanh.f32 %v475_v37  ;;  %v1258_v37 = vld [vmem:[%s1325_s4 + $0x1] ss:$0 sm:$0xff] }
 0x11b   : > { %v477_v38 = vpop.f32.mrf.mxu1 }
 0x11c   : > { %v905_v39 = vpop.eup %904  ;;  %v478_v40 = vadd.f32 %v1189_v35, %v477_v38 }
 0x11d   : > { %576 = vmatmul.f32.vlgmr.msra.gmra.mxu2 %v905_v39 }
 0x11e   : > { %906 = vtanh.f32 %v478_v40 }
 0x123   : > { %v480_v33 = vpop.f32.mrf.mxu1 }
 0x124   : > { %v907_v41 = vpop.eup %906  ;;  %v481_v42 = vadd.f32 %v1189_v35, %v480_v33 }
 0x125   : > { %579 = vmatmul.f32.gmra.mxu2 %v907_v41 }
 0x126   : > { %908 = vtanh.f32 %v481_v42 }
 0x12b   : > { %v483_v43 = vpop.f32.mrf.mxu1 }
 0x12c   : > { %v909_v44 = vpop.eup %908  ;;  %v484_v45 = vadd.f32 %v1189_v35, %v483_v43 }
 0x12d   : > { %582 = vmatmul.f32.gmra.mxu2 %v909_v44 }
 0x12e   : > { %910 = vtanh.f32 %v484_v45 }
 0x133   : > { %v486_v46 = vpop.f32.mrf.mxu1 }
 0x134   : > { %v911_v47 = vpop.eup %910  ;;  %v487_v48 = vadd.f32 %v1189_v35, %v486_v46 }
 0x135   : > { %585 = vmatmul.f32.gmra.mxu2 %v911_v47 }
 0x136   : > { %912 = vtanh.f32 %v487_v48 }
 0x13b   : > { %v489_v49 = vpop.f32.mrf.mxu1 }
 0x13c   : > { %v913_v50 = vpop.eup %912  ;;  %v490_v51 = vadd.f32 %v1189_v35, %v489_v49 }
 0x13d   : > { %588 = vmatmul.f32.gmra.mxu2 %v913_v50 }
 0x13e   : > { %914 = vtanh.f32 %v490_v51 }
 0x143   : > { %v492_v52 = vpop.f32.mrf.mxu1 }
 0x144   : > { %v915_v53 = vpop.eup %914  ;;  %v493_v54 = vadd.f32 %v1189_v35, %v492_v52 }
 0x145   : > { %591 = vmatmul.f32.gmra.mxu2 %v915_v53 }
 0x146   : > { %916 = vtanh.f32 %v493_v54 }
 0x14b   : > { %v495_v55 = vpop.f32.mrf.mxu1 }
 0x14c   : > { %v917_v56 = vpop.eup %916  ;;  %v496_v57 = vadd.f32 %v1189_v35, %v495_v55 }
 0x14d   : > { %594 = vmatmul.f32.gmra.mxu2 %v917_v56 }
 0x14e   : > { %918 = vtanh.f32 %v496_v57 }
 0x153   : > { %v498_v58 = vpop.f32.mrf.mxu1 }
 0x154   : > { %v919_v59 = vpop.eup %918  ;;  %v499_v60 = vadd.f32 %v1189_v35, %v498_v58 }
 0x155   : > { %597 = vmatmul.f32.gmra.mxu2 %v919_v59 }
 0x156   : > { %920 = vtanh.f32 %v499_v60 }
 0x15b   : > { %v501_v61 = vpop.f32.mrf.mxu1 }
 0x15c   : > { %v921_v62 = vpop.eup %920  ;;  %v502_v63 = vadd.f32 %v1189_v35, %v501_v61 }
 0x15d   : > { %600 = vmatmul.f32.gmra.mxu2 %v921_v62 }
 0x15e   : > { %922 = vtanh.f32 %v502_v63 }
 0x163   : > { %v504_v0 = vpop.f32.mrf.mxu1 }
 0x164   : > { %v923_v1 = vpop.eup %922  ;;  %v505_v2 = vadd.f32 %v1189_v35, %v504_v0 }
 0x165   : > { %603 = vmatmul.f32.gmra.mxu2 %v923_v1 }
 0x166   : > { %924 = vtanh.f32 %v505_v2 }
 0x16b   : > { %v507_v4 = vpop.f32.mrf.mxu1 }
 0x16c   : > { %v925_v5 = vpop.eup %924  ;;  %v508_v6 = vadd.f32 %v1189_v35, %v507_v4 }
 0x16d   : > { %606 = vmatmul.f32.gmra.mxu2 %v925_v5 }
 0x16e   : > { %926 = vtanh.f32 %v508_v6 }
 0x173   : > { %v510_v11 = vpop.f32.mrf.mxu1 }
 0x174   : > { %v927_v12 = vpop.eup %926  ;;  %v511_v13 = vadd.f32 %v1189_v35, %v510_v11 }
 0x175   : > { %609 = vmatmul.f32.gmra.mxu2 %v927_v12 }
 0x176   : > { %928 = vtanh.f32 %v511_v13 }
 0x17b   : > { %v513_v19 = vpop.f32.mrf.mxu1 }
 0x17c   : > { %v929_v20 = vpop.eup %928  ;;  %v514_v21 = vadd.f32 %v1189_v35, %v513_v19 }
 0x17d   : > { %612 = vmatmul.f32.gmra.mxu2 %v929_v20  ;;  %v871_v20 = vld [vmem:[%s1327_s6] ss:$0 sm:$0xff] }
 0x17e   : > { %930 = vtanh.f32 %v514_v21 }
 0x183   : > { %v516_v25 = vpop.f32.mrf.mxu1 }
 0x184   : > { %v931_v27 = vpop.eup %930  ;;  %v517_v28 = vadd.f32 %v1189_v35, %v516_v25 }
 0x185   : > { %615 = vmatmul.f32.gmra.mxu2 %v931_v27 }
 0x186   : > { %932 = vtanh.f32 %v517_v28 }
 0x18b   : > { %v519_v31 = vpop.f32.mrf.mxu1 }
 0x18c   : > { %v933_v32 = vpop.eup %932  ;;  %v520_v34 = vadd.f32 %v1189_v35, %v519_v31 }
 0x18d   : > { %618 = vmatmul.f32.gmra.mxu2 %v933_v32 }
 0x18e   : > { %934 = vtanh.f32 %v520_v34 }
 0x194   : > { %v935_v36 = vpop.eup %934 }
 0x195   : > { %621 = vmatmul.f32.gmra.mxu2 %v935_v36 }
 0x1a0   : > { %v577_v38 = vpop.f32.mrf.mxu2 }
 0x1a1   : > { %v578_v39 = vadd.f32 %v1258_v37, %v577_v38 }
 0x1a3   : > { %936 = vtanh.f32 %v578_v39 }
 0x1a8   : > { %v580_v40 = vpop.f32.mrf.mxu2 }
 0x1a9   : > { %v937_v33 = vpop.eup %936  ;;  %v581_v41 = vadd.f32 %v1258_v37, %v580_v40 }
 0x1aa   : > { %677 = vmatmul.f32.vlgmr.msra.gmra.mxu3 %v937_v33 }
 0x1ab   : > { %938 = vtanh.f32 %v581_v41 }
 0x1b0   : > { %v583_v35 = vpop.f32.mrf.mxu2 }
 0x1b1   : > { %v939_v42 = vpop.eup %938  ;;  %v584_v43 = vadd.f32 %v1258_v37, %v583_v35 }
 0x1b2   : > { %680 = vmatmul.f32.gmra.mxu3 %v939_v42 }
 0x1b3   : > { %940 = vtanh.f32 %v584_v43 }
 0x1b8   : > { %v586_v44 = vpop.f32.mrf.mxu2 }
 0x1b9   : > { %v941_v45 = vpop.eup %940  ;;  %v587_v46 = vadd.f32 %v1258_v37, %v586_v44 }
 0x1ba   : > { %683 = vmatmul.f32.gmra.mxu3 %v941_v45 }
 0x1bb   : > { %942 = vtanh.f32 %v587_v46 }
 0x1c0   : > { %v589_v47 = vpop.f32.mrf.mxu2 }
 0x1c1   : > { %v943_v48 = vpop.eup %942  ;;  %v590_v49 = vadd.f32 %v1258_v37, %v589_v47 }
 0x1c2   : > { %686 = vmatmul.f32.gmra.mxu3 %v943_v48 }
 0x1c3   : > { %944 = vtanh.f32 %v590_v49 }
 0x1c8   : > { %v592_v50 = vpop.f32.mrf.mxu2 }
 0x1c9   : > { %v945_v51 = vpop.eup %944  ;;  %v593_v52 = vadd.f32 %v1258_v37, %v592_v50 }
 0x1ca   : > { %689 = vmatmul.f32.gmra.mxu3 %v945_v51 }
 0x1cb   : > { %946 = vtanh.f32 %v593_v52 }
 0x1d0   : > { %v595_v53 = vpop.f32.mrf.mxu2 }
 0x1d1   : > { %v947_v54 = vpop.eup %946  ;;  %v596_v55 = vadd.f32 %v1258_v37, %v595_v53 }
 0x1d2   : > { %692 = vmatmul.f32.gmra.mxu3 %v947_v54 }
 0x1d3   : > { %948 = vtanh.f32 %v596_v55 }
 0x1d8   : > { %v598_v56 = vpop.f32.mrf.mxu2 }
 0x1d9   : > { %v949_v57 = vpop.eup %948  ;;  %v599_v58 = vadd.f32 %v1258_v37, %v598_v56 }
 0x1da   : > { %695 = vmatmul.f32.gmra.mxu3 %v949_v57 }
 0x1db   : > { %950 = vtanh.f32 %v599_v58 }
 0x1e0   : > { %v601_v59 = vpop.f32.mrf.mxu2 }
 0x1e1   : > { %v951_v60 = vpop.eup %950  ;;  %v602_v61 = vadd.f32 %v1258_v37, %v601_v59 }
 0x1e2   : > { %698 = vmatmul.f32.gmra.mxu3 %v951_v60 }
 0x1e3   : > { %952 = vtanh.f32 %v602_v61 }
 0x1e8   : > { %v604_v62 = vpop.f32.mrf.mxu2 }
 0x1e9   : > { %v953_v63 = vpop.eup %952  ;;  %v605_v0 = vadd.f32 %v1258_v37, %v604_v62 }
 0x1ea   : > { %701 = vmatmul.f32.gmra.mxu3 %v953_v63 }
 0x1eb   : > { %954 = vtanh.f32 %v605_v0 }
 0x1f0   : > { %v607_v1 = vpop.f32.mrf.mxu2 }
 0x1f1   : > { %v955_v2 = vpop.eup %954  ;;  %v608_v3 = vadd.f32 %v1258_v37, %v607_v1 }
 0x1f2   : > { %704 = vmatmul.f32.gmra.mxu3 %v955_v2 }
 0x1f3   : > { %956 = vtanh.f32 %v608_v3 }
 0x1f8   : > { %v610_v4 = vpop.f32.mrf.mxu2 }
 0x1f9   : > { %v957_v5 = vpop.eup %956  ;;  %v611_v6 = vadd.f32 %v1258_v37, %v610_v4 }
 0x1fa   : > { %707 = vmatmul.f32.gmra.mxu3 %v957_v5 }
 0x1fb   : > { %958 = vtanh.f32 %v611_v6 }
 0x200   : > { %v613_v7 = vpop.f32.mrf.mxu2 }
 0x201   : > { %v959_v8 = vpop.eup %958  ;;  %v614_v9 = vadd.f32 %v1258_v37, %v613_v7 }
 0x202   : > { %710 = vmatmul.f32.gmra.mxu3 %v959_v8 }
 0x203   : > { %960 = vtanh.f32 %v614_v9 }
 0x208   : > { %v616_v10 = vpop.f32.mrf.mxu2 }
 0x209   : > { %v961_v11 = vpop.eup %960  ;;  %v617_v12 = vadd.f32 %v1258_v37, %v616_v10 }
 0x20a   : > { %713 = vmatmul.f32.gmra.mxu3 %v961_v11 }
 0x20b   : > { %962 = vtanh.f32 %v617_v12 }
 0x210   : > { %v619_v13 = vpop.f32.mrf.mxu2 }
 0x211   : > { %v963_v14 = vpop.eup %962  ;;  %v620_v15 = vadd.f32 %v1258_v37, %v619_v13 }
 0x212   : > { %716 = vmatmul.f32.gmra.mxu3 %v963_v14 }
 0x213   : > { %964 = vtanh.f32 %v620_v15 }
 0x218   : > { %v622_v16 = vpop.f32.mrf.mxu2 }
 0x219   : > { %v965_v17 = vpop.eup %964  ;;  %v623_v18 = vadd.f32 %v1258_v37, %v622_v16 }
 0x21a   : > { %719 = vmatmul.f32.gmra.mxu3 %v965_v17 }
 0x21b   : > { %966 = vtanh.f32 %v623_v18 }
 0x221   : > { %v967_v19 = vpop.eup %966 }
 0x222   : > { %722 = vmatmul.f32.gmra.mxu3 %v967_v19 }
 0x22d   : > { %v678_v21 = vpop.f32.mrf.mxu3 }
 0x22e   : > { %v679_v22 = vadd.f32 %v871_v20, %v678_v21 }
 0x230   : > { %727 = vst.msk [vmem:[%s1284_s17] sm:$0xff] %vm726_vm2, %v679_v22 }
 0x235   : > { %v681_v23 = vpop.f32.mrf.mxu3 }
 0x236   : > { %v682_v24 = vadd.f32 %v871_v20, %v681_v23 }
 0x238   : > { %728 = vst.msk [vmem:[%s1284_s17 + $0x8] sm:$0xff] %vm726_vm2, %v682_v24 }
 0x23d   : > { %v684_v25 = vpop.f32.mrf.mxu3 }
 0x23e   : > { %v685_v26 = vadd.f32 %v871_v20, %v684_v25 }
 0x240   : > { %729 = vst.msk [vmem:[%s1284_s17 + $0x10] sm:$0xff] %vm726_vm2, %v685_v26 }
 0x245   : > { %v687_v27 = vpop.f32.mrf.mxu3 }
 0x246   : > { %v688_v28 = vadd.f32 %v871_v20, %v687_v27 }
 0x248   : > { %730 = vst.msk [vmem:[%s1284_s17 + $0x18] sm:$0xff] %vm726_vm2, %v688_v28 }
 0x24d   : > { %v690_v29 = vpop.f32.mrf.mxu3 }
 0x24e   : > { %v691_v30 = vadd.f32 %v871_v20, %v690_v29 }
 0x250   : > { %731 = vst.msk [vmem:[%s1284_s17 + $0x20] sm:$0xff] %vm726_vm2, %v691_v30 }
 0x255   : > { %v693_v31 = vpop.f32.mrf.mxu3 }
 0x256   : > { %v694_v32 = vadd.f32 %v871_v20, %v693_v31 }
 0x258   : > { %732 = vst.msk [vmem:[%s1284_s17 + $0x28] sm:$0xff] %vm726_vm2, %v694_v32 }
 0x25d   : > { %v696_v34 = vpop.f32.mrf.mxu3 }
 0x25e   : > { %v697_v36 = vadd.f32 %v871_v20, %v696_v34 }
 0x260   : > { %733 = vst.msk [vmem:[%s1284_s17 + $0x30] sm:$0xff] %vm726_vm2, %v697_v36 }
 0x265   : > { %v699_v37 = vpop.f32.mrf.mxu3 }
 0x266   : > { %v700_v38 = vadd.f32 %v871_v20, %v699_v37 }
 0x268   : > { %734 = vst.msk [vmem:[%s1284_s17 + $0x38] sm:$0xff] %vm726_vm2, %v700_v38 }
 0x26d   : > { %v702_v39 = vpop.f32.mrf.mxu3 }
 0x26e   : > { %v703_v40 = vadd.f32 %v871_v20, %v702_v39 }
 0x270   : > { %735 = vst.msk [vmem:[%s1284_s17 + $0x40] sm:$0xff] %vm726_vm2, %v703_v40 }
 0x275   : > { %v705_v33 = vpop.f32.mrf.mxu3 }
 0x276   : > { %v706_v41 = vadd.f32 %v871_v20, %v705_v33 }
 0x278   : > { %736 = vst.msk [vmem:[%s1284_s17 + $0x48] sm:$0xff] %vm726_vm2, %v706_v41 }
 0x27d   : > { %v708_v35 = vpop.f32.mrf.mxu3 }
 0x27e   : > { %v709_v42 = vadd.f32 %v871_v20, %v708_v35 }
 0x280   : > { %737 = vst.msk [vmem:[%s1284_s17 + $0x50] sm:$0xff] %vm726_vm2, %v709_v42 }
 0x285   : > { %v711_v43 = vpop.f32.mrf.mxu3 }
 0x286   : > { %v712_v44 = vadd.f32 %v871_v20, %v711_v43 }
 0x288   : > { %738 = vst.msk [vmem:[%s1284_s17 + $0x58] sm:$0xff] %vm726_vm2, %v712_v44 }
 0x28d   : > { %v714_v45 = vpop.f32.mrf.mxu3 }
 0x28e   : > { %v715_v46 = vadd.f32 %v871_v20, %v714_v45 }
 0x290   : > { %739 = vst.msk [vmem:[%s1284_s17 + $0x60] sm:$0xff] %vm726_vm2, %v715_v46 }
 0x295   : > { %v717_v47 = vpop.f32.mrf.mxu3 }
 0x296   : > { %v718_v48 = vadd.f32 %v871_v20, %v717_v47 }
 0x298   : > { %740 = vst.msk [vmem:[%s1284_s17 + $0x68] sm:$0xff] %vm726_vm2, %v718_v48 }
 0x29d   : > { %v720_v49 = vpop.f32.mrf.mxu3 }
 0x29e   : > { %v721_v50 = vadd.f32 %v871_v20, %v720_v49 }
 0x2a0   : > { %741 = vst.msk [vmem:[%s1284_s17 + $0x70] sm:$0xff] %vm726_vm2, %v721_v50 }
 0x2a5   : > { %v723_v51 = vpop.f32.mrf.mxu3 }
 0x2a6   : > { %v724_v52 = vadd.f32 %v871_v20, %v723_v51 }
 0x2a8   : > { %742 = vst.msk [vmem:[%s1284_s17 + $0x78] sm:$0xff] %vm726_vm2, %v724_v52 }
 0x2a9 PF: > { %s17_s24 = sadd.s32 1, %s974_s24  }
 0x2aa   : > { %p14_p4 = scmp.ge.s32.totalorder %s17_s24, 6  }
 0x2ac   :  { %16 = sbr.rel (!%p14_p4) target bundleno = 1 (0x1), region = 80 }

</bundles_post_ra>
